<compile_context>
chip_gen: v7x
topology: tpu7x:2x2x1
jax: 0.10.0
libtpu: 0.0.40
codegen_flags: <defaults>
</compile_context>

<pallas_src>
import functools

import numpy as np
import jax
import jax.numpy as jnp
from jax.experimental import pallas as pl
from jax.experimental.pallas import tpu as pltpu


def _round_up(x, m):
    return (x + m - 1) // m * m


# ---------------------------------------------------------------------------
# Phase 1: input projection for all timesteps, both directions.
#   x2d (T_pad*B_pad, E) @ W_in[d] (E, 4H) + bias[d]  ->  gates (2, T_pad*B_pad, 4H)
# ---------------------------------------------------------------------------
def _in_proj_kernel(x_ref, w_ref, b_ref, out_ref):
    x = x_ref[...]                                    # (RM, E) bf16
    for d in range(2):                                # static: fwd / bwd
        acc = jnp.dot(x, w_ref[d], preferred_element_type=jnp.float32)
        out_ref[d] = (acc + b_ref[d]).astype(out_ref.dtype)


def input_projection(x_tbe, w_in, bias, *, tt):
    """x_tbe (T_pad, B_pad, E) bf16 -> gate slab (2, T_pad, B_pad, 4H) f32."""
    T_pad, B_pad, E = x_tbe.shape
    G = w_in.shape[-1]                                # 4H
    nc = T_pad // tt
    rm = tt * B_pad                                   # rows per grid step (mult of 8)
    x2d = x_tbe.reshape(T_pad * B_pad, E)

    out = pl.pallas_call(
        _in_proj_kernel,
        out_shape=jax.ShapeDtypeStruct((2, T_pad * B_pad, G), jnp.float32),
        grid=(nc,),
        in_specs=[
            pl.BlockSpec((rm, E), lambda i: (i, 0)),          # x rows
            pl.BlockSpec((2, E, G), lambda i: (0, 0, 0)),     # W_in (loop-invariant)
            pl.BlockSpec((2, 1, G), lambda i: (0, 0, 0)),     # bias (loop-invariant)
        ],
        out_specs=pl.BlockSpec((2, rm, G), lambda i: (0, i, 0)),
        compiler_params=pltpu.CompilerParams(
            dimension_semantics=("parallel",)),               # megacore-splittable
    )(x2d, w_in, bias)
    return out.reshape(2, T_pad, B_pad, G)


# ---------------------------------------------------------------------------
# Phase 2: fused bidirectional recurrence, TT timesteps per grid step.
# ---------------------------------------------------------------------------
def _bilstm_rec_kernel(len_ref, gf_ref, gb_ref, wrec_hbm,
                       out_f_ref, out_b_ref,
                       w_vmem, h_sc, c_sc, *, tt, hidden, nc):
    H = hidden
    c_idx = pl.program_id(0)

    @pl.when(c_idx == 0)
    def _init():
        # Stage the (loop-invariant) recurrent weights once -> single-buffered VMEM.
        pltpu.sync_copy(wrec_hbm, w_vmem)
        h_sc[...] = jnp.zeros_like(h_sc)
        c_sc[...] = jnp.zeros_like(c_sc)

    lengths = len_ref[...]                            # (B, 1) int32
    w_rec = w_vmem[...]                               # (2H, 8H) bf16, block-diagonal
    t0_f = c_idx * tt                                 # first fwd timestep of the chunk
    t0_b = (nc - 1 - c_idx) * tt                      # first timestep of the bwd chunk

    def cell(z, c_prev):                              # z (B, 4H) [i f g o], c (B, H)
        i = jax.nn.sigmoid(z[:, 0:H])
        f = jax.nn.sigmoid(z[:, H:2 * H])
        g = jnp.tanh(z[:, 2 * H:3 * H])
        o = jax.nn.sigmoid(z[:, 3 * H:4 * H])
        c_new = f * c_prev + i * g
        h_new = o * jnp.tanh(c_new)
        return h_new, c_new

    def step(s, carry):
        h, cc = carry                                 # (B, 2H) f32 each: [fwd | bwd]
        pre_f = gf_ref[0, s]                          # (B, 4H) precomputed xW+b (fwd)
        pre_b = gb_ref[0, tt - 1 - s]                 # (B, 4H) precomputed xW+b (bwd)

        # single block-diagonal recurrent matmul for both directions (N = 8H = 256)
        rec = jnp.dot(h.astype(w_rec.dtype), w_rec,
                      preferred_element_type=jnp.float32)      # (B, 8H)
        hf, cf = cell(pre_f + rec[:, :4 * H], cc[:, :H])
        hb, cb = cell(pre_b + rec[:, 4 * H:], cc[:, H:])

        tf = t0_f + s                                 # actual fwd timestep
        tb = t0_b + (tt - 1 - s)                      # actual bwd timestep
        vf = tf < lengths                             # (B, 1) bool
        vb = tb < lengths

        out_f_ref[s] = jnp.where(vf, hf, 0.0).astype(out_f_ref.dtype)
        out_b_ref[tt - 1 - s] = jnp.where(vb, hb, 0.0).astype(out_b_ref.dtype)

        h_next = jnp.concatenate(
            [jnp.where(vf, hf, h[:, :H]), jnp.where(vb, hb, h[:, H:])], axis=-1)
        c_next = jnp.concatenate(
            [jnp.where(vf, cf, cc[:, :H]), jnp.where(vb, cb, cc[:, H:])], axis=-1)
        return h_next, c_next

    h_fin, c_fin = jax.lax.fori_loop(0, tt, step, (h_sc[...], c_sc[...]),
                                     unroll=True)
    h_sc[...] = h_fin
    c_sc[...] = c_fin


def bilstm_recurrence(gates, lengths_b1, w_rec, *, hidden, tt):
    """gates (2, T_pad, B_pad, 4H) f32 -> (out_fwd, out_bwd), each (T_pad, B_pad, H)."""
    _, T_pad, B_pad, G = gates.shape
    nc = T_pad // tt
    kernel = functools.partial(_bilstm_rec_kernel, tt=tt, hidden=hidden, nc=nc)

    out_f, out_b = pl.pallas_call(
        kernel,
        out_shape=(jax.ShapeDtypeStruct((T_pad, B_pad, hidden), jnp.float32),
                   jax.ShapeDtypeStruct((T_pad, B_pad, hidden), jnp.float32)),
        grid=(nc,),
        in_specs=[
            pl.BlockSpec((B_pad, 1), lambda c: (0, 0)),                  # lengths
            pl.BlockSpec((1, tt, B_pad, G), lambda c: (0, c, 0, 0)),     # fwd gate chunk
            pl.BlockSpec((1, tt, B_pad, G), lambda c: (1, nc - 1 - c, 0, 0)),  # bwd chunk
            pl.BlockSpec(memory_space=pl.ANY),                           # W_rec (HBM)
        ],
        out_specs=(pl.BlockSpec((tt, B_pad, hidden), lambda c: (c, 0, 0)),
                   pl.BlockSpec((tt, B_pad, hidden), lambda c: (nc - 1 - c, 0, 0))),
        scratch_shapes=[
            pltpu.VMEM((2 * hidden, 8 * hidden), w_rec.dtype),   # staged W_rec
            pltpu.VMEM((B_pad, 2 * hidden), jnp.float32),        # h state [fwd|bwd]
            pltpu.VMEM((B_pad, 2 * hidden), jnp.float32),        # c state [fwd|bwd]
        ],
        compiler_params=pltpu.CompilerParams(
            dimension_semantics=("arbitrary",)),                  # sequential recurrence
    )(lengths_b1, gates, gates, w_rec)
    return out_f, out_b


# ---------------------------------------------------------------------------
# Module wrapper (parameter setup + layer stacking = plain JAX glue)
# ---------------------------------------------------------------------------
class BiLSTM:
    def __init__(self, config, key):
        self.bidirectional = config['bidirectional']
        self.num_layers = config['num_layers']
        self.hidden_dim = config['hidden_dim']
        self.embedding_dim = config['embedding_dim']
        assert self.bidirectional, "this kernel implements the bidirectional config"

        H = self.hidden_dim
        k = 1.0 / np.sqrt(H)                         # PyTorch LSTM default init range
        self.params = []
        for layer in range(self.num_layers):
            in_dim = self.embedding_dim if layer == 0 else 2 * H
            layer_params = []
            for _direction in range(2):
                key, k1, k2, k3, k4 = jax.random.split(key, 5)
                wih = jax.random.uniform(k1, (4 * H, in_dim), jnp.float32, -k, k)
                whh = jax.random.uniform(k2, (4 * H, H), jnp.float32, -k, k)
                b_ih = jax.random.uniform(k3, (4 * H,), jnp.float32, -k, k)
                b_hh = jax.random.uniform(k4, (4 * H,), jnp.float32, -k, k)
                layer_params.append((wih, whh, b_ih, b_hh))
            self.params.append(layer_params)

        # kernel-layout parameters (bf16 matmul operands, f32 bias)
        self.kernel_params = [self._prep_layer(lp) for lp in self.params]

    @staticmethod
    def _prep_layer(layer_params):
        (wih_f, whh_f, bif, bhf), (wih_b, whh_b, bib, bhb) = layer_params
        H = whh_f.shape[1]
        w_in = jnp.stack([wih_f.T, wih_b.T], axis=0).astype(jnp.bfloat16)   # (2, E, 4H)
        bias = jnp.stack([(bif + bhf).reshape(1, -1),
                          (bib + bhb).reshape(1, -1)], axis=0)              # (2, 1, 4H) f32
        # block-diagonal recurrent weight: rows 0:H -> fwd cols, rows H:2H -> bwd cols
        w_rec = jnp.zeros((2 * H, 8 * H), jnp.float32)
        w_rec = w_rec.at[:H, :4 * H].set(whh_f.T)
        w_rec = w_rec.at[H:, 4 * H:].set(whh_b.T)
        w_rec = w_rec.astype(jnp.bfloat16)                                  # (2H, 8H)
        return w_in, bias, w_rec

    def forward(self, emb, len_inp, hidden=None):
        # emb: (B, T, E) batch-first; len_inp: host int lengths (B,)
        # TODO(synk): the original forward never threads a non-None `hidden`; ignored.
        len_np = np.asarray(len_inp).astype(np.int32)
        B = emb.shape[0]
        max_len = int(len_np.max())                  # pad_packed_sequence pads to max(len)
        H = self.hidden_dim

        tt = min(16, max_len)                        # timesteps per grid step
        T_pad = _round_up(max_len, tt)
        B_pad = _round_up(B, 8)                      # sublane quantum

        x = jnp.transpose(emb[:, :max_len, :], (1, 0, 2))         # (T, B, E)
        x = jnp.pad(x, ((0, T_pad - max_len), (0, B_pad - B), (0, 0)))
        x = x.astype(jnp.bfloat16)

        lengths = np.zeros((B_pad, 1), np.int32)
        lengths[:B, 0] = len_np                      # padded batch rows: length 0
        lengths = jnp.asarray(lengths)

        out_f = out_b = None
        for li, (w_in, bias, w_rec) in enumerate(self.kernel_params):
            gates = input_projection(x, w_in, bias, tt=tt)
            out_f, out_b = bilstm_recurrence(gates, lengths, w_rec, hidden=H, tt=tt)
            if li + 1 < self.num_layers:
                x = jnp.concatenate([out_f, out_b], axis=-1).astype(jnp.bfloat16)

        y = jnp.concatenate([out_f, out_b], axis=-1)              # (T_pad, B_pad, 2H)
        y = y[:max_len, :B]
        return jnp.transpose(y, (1, 0, 2))                        # (B, max_len, 2H)


# ---------------------------------------------------------------------------
# Pure-JAX reference (lax.scan) for correctness checking
# ---------------------------------------------------------------------------
def _lstm_dir_ref(x_tbe, lengths, wih, whh, b_ih, b_hh, reverse, matmul_dtype):
    T, B, _ = x_tbe.shape
    H = whh.shape[1]
    wih_t = wih.T.astype(matmul_dtype)
    whh_t = whh.T.astype(matmul_dtype)
    b = b_ih + b_hh

    def step(carry, inp):
        h, c = carry
        x_t, t = inp
        gates = (jnp.dot(x_t.astype(matmul_dtype), wih_t,
                         preferred_element_type=jnp.float32)
                 + jnp.dot(h.astype(matmul_dtype), whh_t,
                           preferred_element_type=jnp.float32) + b)
        i = jax.nn.sigmoid(gates[:, :H])
        f = jax.nn.sigmoid(gates[:, H:2 * H])
        g = jnp.tanh(gates[:, 2 * H:3 * H])
        o = jax.nn.sigmoid(gates[:, 3 * H:])
        c_new = f * c + i * g
        h_new = o * jnp.tanh(c_new)
        valid = (t < lengths)[:, None]
        out = jnp.where(valid, h_new, 0.0)
        return (jnp.where(valid, h_new, h), jnp.where(valid, c_new, c)), out

    ts = jnp.arange(T)
    xs, tss = (x_tbe[::-1], ts[::-1]) if reverse else (x_tbe, ts)
    _, outs = jax.lax.scan(step, (jnp.zeros((B, H), jnp.float32),
                                  jnp.zeros((B, H), jnp.float32)), (xs, tss))
    return outs[::-1] if reverse else outs


def bilstm_reference(params, emb, len_inp, matmul_dtype=jnp.float32):
    len_np = np.asarray(len_inp)
    max_len = int(len_np.max())
    lengths = jnp.asarray(len_np, dtype=jnp.int32)
    x = jnp.transpose(emb[:, :max_len, :], (1, 0, 2)).astype(jnp.float32)
    for layer_params in params:
        fwd = _lstm_dir_ref(x, lengths, *layer_params[0], False, matmul_dtype)
        bwd = _lstm_dir_ref(x, lengths, *layer_params[1], True, matmul_dtype)
        x = jnp.concatenate([fwd, bwd], axis=-1)
    return jnp.transpose(x, (1, 0, 2))


if __name__ == "__main__":
    config = {'bidirectional': True, 'num_layers': 1,
              'hidden_dim': 32, 'embedding_dim': 16}

    key = jax.random.PRNGKey(0)
    key, pkey, xkey = jax.random.split(key, 3)
    model = BiLSTM(config, pkey)

    # variable lengths; T=24 exercises multi-chunk grid, time padding, batch padding
    B, T = 4, 24
    emb = jax.random.normal(xkey, (B, T, config['embedding_dim']), jnp.float32)
    len_inp = np.array([24, 17, 9, 3], dtype=np.int32)

    out = jax.block_until_ready(model.forward(emb, len_inp))      # (B, max_len, 2H)
    assert out.shape == (B, int(len_inp.max()), 2 * config['hidden_dim'])

    # tight check vs. a reference with the same precision policy (bf16 matmul, f32 state)
    ref_bf16 = bilstm_reference(model.params, emb, len_inp, jnp.bfloat16)
    np.testing.assert_allclose(np.asarray(out), np.asarray(ref_bf16),
                               rtol=2e-4, atol=2e-4)

    # loose check vs. the full-f32 reference (bf16 matmul-input rounding drift)
    ref_f32 = bilstm_reference(model.params, emb, len_inp, jnp.float32)
    np.testing.assert_allclose(np.asarray(out), np.asarray(ref_f32),
                               rtol=5e-2, atol=5e-2)

    # stacked-layer config exercises the 2H-wide inter-layer input path
    config2 = {'bidirectional': True, 'num_layers': 2,
               'hidden_dim': 32, 'embedding_dim': 16}
    key, pkey2, xkey2 = jax.random.split(key, 3)
    model2 = BiLSTM(config2, pkey2)
    emb2 = jax.random.normal(xkey2, (B, 8, config2['embedding_dim']), jnp.float32)
    len2 = np.array([8, 5, 3, 6], dtype=np.int32)
    out2 = jax.block_until_ready(model2.forward(emb2, len2))
    ref2 = bilstm_reference(model2.params, emb2, len2, jnp.bfloat16)
    np.testing.assert_allclose(np.asarray(out2), np.asarray(ref2),
                               rtol=2e-4, atol=2e-4)

    print("KERNEL_OK")
</pallas_src>

<mosaic_0001>
module attributes {stable_mosaic.version = 11 : i64} {
  func.func @_in_proj_kernel(%arg0: i32, %arg1: memref<128x16xbf16, #tpu.memory_space<vmem>>, %arg2: memref<2x16x128xbf16, #tpu.memory_space<vmem>>, %arg3: memref<2x1x128xf32, #tpu.memory_space<vmem>>, %arg4: memref<2x128x128xf32, #tpu.memory_space<vmem>>) attributes {dimension_semantics = [#tpu.dimension_semantics<parallel>], iteration_bounds = array<i64: 2>, scalar_prefetch = 0 : i64, scratch_operands = 0 : i64, tpu.core_type = #tpu.core_type<tc>, window_params = [{transform_indices = @transform_0, window_bounds = array<i64: 128, 16>}, {pipeline_mode = #tpu.pipeline_mode<synchronous>, transform_indices = @transform_1, window_bounds = array<i64: 2, 16, 128>}, {pipeline_mode = #tpu.pipeline_mode<synchronous>, transform_indices = @transform_2, window_bounds = array<i64: 2, 1, 128>}, {transform_indices = @transform_3, window_bounds = array<i64: 2, 128, 128>}]} {
    %c0 = arith.constant 0 : index
    %c0_0 = arith.constant 0 : index
    %0 = vector.load %arg1[%c0, %c0_0] : memref<128x16xbf16, #tpu.memory_space<vmem>>, vector<128x16xbf16>
    %c0_1 = arith.constant 0 : index
    %c0_2 = arith.constant 0 : index
    %c0_3 = arith.constant 0 : index
    %1 = vector.load %arg2[%c0_1, %c0_2, %c0_3] : memref<2x16x128xbf16, #tpu.memory_space<vmem>>, vector<1x16x128xbf16>
    %2 = vector.shape_cast %1 : vector<1x16x128xbf16> to vector<16x128xbf16>
    %cst = arith.constant dense<0.000000e+00> : vector<128x128xf32>
    %3 = tpu.matmul %0, %2, %cst {dimension_numbers = #tpu.dot_dimension_numbers<[1], [0], [0], [1], [0, 0, 1, 1], [], []>} : vector<128x16xbf16>, vector<16x128xbf16>, vector<128x128xf32> -> vector<128x128xf32>
    %c0_4 = arith.constant 0 : index
    %c0_5 = arith.constant 0 : index
    %c0_6 = arith.constant 0 : index
    %4 = vector.load %arg3[%c0_4, %c0_5, %c0_6] : memref<2x1x128xf32, #tpu.memory_space<vmem>>, vector<1x1x128xf32>
    %5 = vector.shape_cast %4 : vector<1x1x128xf32> to vector<1x128xf32>
    %6 = vector.broadcast %5 : vector<1x128xf32> to vector<128x128xf32>
    %7 = arith.addf %3, %6 : vector<128x128xf32>
    %c0_7 = arith.constant 0 : index
    %c0_8 = arith.constant 0 : index
    %c0_9 = arith.constant 0 : index
    %8 = vector.load %arg4[%c0_7, %c0_8, %c0_9] : memref<2x128x128xf32, #tpu.memory_space<vmem>>, vector<1x128x128xf32>
    %9 = vector.shape_cast %8 : vector<1x128x128xf32> to vector<128x128xf32>
    %10 = vector.shape_cast %7 : vector<128x128xf32> to vector<1x128x128xf32>
    tpu.vector_store %arg4[%c0_7, %c0_8, %c0_9], %10 {strides = array<i32>} : memref<2x128x128xf32, #tpu.memory_space<vmem>>, vector<1x128x128xf32>,
    %c1 = arith.constant 1 : index
    %c0_10 = arith.constant 0 : index
    %c0_11 = arith.constant 0 : index
    %11 = vector.load %arg2[%c1, %c0_10, %c0_11] : memref<2x16x128xbf16, #tpu.memory_space<vmem>>, vector<1x16x128xbf16>
    %12 = vector.shape_cast %11 : vector<1x16x128xbf16> to vector<16x128xbf16>
    %cst_12 = arith.constant dense<0.000000e+00> : vector<128x128xf32>
    %13 = tpu.matmul %0, %12, %cst_12 {dimension_numbers = #tpu.dot_dimension_numbers<[1], [0], [0], [1], [0, 0, 1, 1], [], []>} : vector<128x16xbf16>, vector<16x128xbf16>, vector<128x128xf32> -> vector<128x128xf32>
    %c1_13 = arith.constant 1 : index
    %c0_14 = arith.constant 0 : index
    %c0_15 = arith.constant 0 : index
    %14 = vector.load %arg3[%c1_13, %c0_14, %c0_15] : memref<2x1x128xf32, #tpu.memory_space<vmem>>, vector<1x1x128xf32>
    %15 = vector.shape_cast %14 : vector<1x1x128xf32> to vector<1x128xf32>
    %16 = vector.broadcast %15 : vector<1x128xf32> to vector<128x128xf32>
    %17 = arith.addf %13, %16 : vector<128x128xf32>
    %c1_16 = arith.constant 1 : index
    %c0_17 = arith.constant 0 : index
    %c0_18 = arith.constant 0 : index
    %18 = vector.load %arg4[%c1_16, %c0_17, %c0_18] : memref<2x128x128xf32, #tpu.memory_space<vmem>>, vector<1x128x128xf32>
    %19 = vector.shape_cast %18 : vector<1x128x128xf32> to vector<128x128xf32>
    %20 = vector.shape_cast %17 : vector<128x128xf32> to vector<1x128x128xf32>
    tpu.vector_store %arg4[%c1_16, %c0_17, %c0_18], %20 {strides = array<i32>} : memref<2x128x128xf32, #tpu.memory_space<vmem>>, vector<1x128x128xf32>,
    return
  }
  func.func @transform_0(%arg0: i32) -> (i32, i32) {
    %c0_i32 = arith.constant 0 : i32
    %c0_i32_0 = arith.constant 0 : i32
    return %arg0, %c0_i32 : i32, i32
  }
  func.func @transform_1(%arg0: i32) -> (i32, i32, i32) {
    %c0_i32 = arith.constant 0 : i32
    %c0_i32_0 = arith.constant 0 : i32
    %c0_i32_1 = arith.constant 0 : i32
    %c0_i32_2 = arith.constant 0 : i32
    return %c0_i32, %c0_i32_0, %c0_i32_1 : i32, i32, i32
  }
  func.func @transform_2(%arg0: i32) -> (i32, i32, i32) {
    %c0_i32 = arith.constant 0 : i32
    %c0_i32_0 = arith.constant 0 : i32
    %c0_i32_1 = arith.constant 0 : i32
    %c0_i32_2 = arith.constant 0 : i32
    return %c0_i32, %c0_i32_0, %c0_i32_1 : i32, i32, i32
  }
  func.func @transform_3(%arg0: i32) -> (i32, i32, i32) {
    %c0_i32 = arith.constant 0 : i32
    %c0_i32_0 = arith.constant 0 : i32
    %c0_i32_1 = arith.constant 0 : i32
    return %c0_i32, %arg0, %c0_i32_0 : i32, i32, i32
  }
}

</mosaic_0001>

<bundles_post_ra>
// kernel: tpu_custom_call.1
= control target key start
LH: loop header
LB: loop body
LE: loop exit
PB: predicated region body
PF: predicated region fallthrough
CT: control target
= control target key end

     0   :  { %8 = vsyncpa [#allocation3], 0  ;;  %s1048_s0 = inlined_call_operand.vmem [shape: bf16[256,16], index: 0, kind: input, shape index: {}]   ;;  %s1049_s1 = inlined_call_operand.vmem [shape: bf16[2,16,128], index: 1, kind: input, shape index: {}]   ;;  %s1050_s2 = inlined_call_operand.vmem [shape: f32[2,1,128], index: 2, kind: input, shape index: {}]   ;;  %s1051_s3 = inlined_call_operand.hbm [shape: f32[2,256,128], index: 3, kind: output, shape index: {}]  }
   0x1   :  { %10 = vsyncpa [#allocation3 + $0x1], 0  ;;  %s857_s12 = smov 0   ;;  %s859_s13 = smov 0  }
   0x2   :  { %s861_s14 = smov 0   ;;  %s863_s15 = smov 0  }
   0x3 LB: > { %s878_s16 = sadd.s32 4294967295, %s828_s15   ;;  %s618_s17 = sadd.s32 4294967294, %s828_s15   ;;  %s828_s15 = sphi %s863_s15, %s1057_s15   ;;  %s824_s14 = sphi %s861_s14, %s1056_s14   ;;  %s820_s13 = sphi %s859_s13, %s1055_s13   ;;  %s816_s12 = sphi %s857_s12, %s1054_s12  }
   0x4   : > { %s882_s18 = sadd.s32 1, %s828_s15   ;;  %s91_s19 = sadd.s32 1, %s824_s14 }
   0x5   : > { %s88_s20 = ssub.s32 %s828_s15, %s882_s18  ;;  %p101_p0 = scmp.ne.s32.totalorder %s824_s14, %s820_s13 }
   0x6   : > { %p89_p1 = scmp.eq.s32.totalorder %s88_s20, 0  ;;  %p102_p2 = scmp.eq.s32.totalorder %s878_s16, 1 }
   0x7   : > { %p107_p3 = scmp.ne.s32.totalorder %s820_s13, %s816_s12  ;;  %p108_p4 = scmp.eq.s32.totalorder %s618_s17, 1 }
   0x8   : > { %s893_s21 = scalar_select %p89_p1, %s824_s14, %s91_s19  }
   0x9   : > { %p895_p5 = por %p102_p2, %p101_p0  ;;  %p899_p6 = por %p108_p4, %p107_p3 }
   0xa   : > { %p621_p7 = scmp.ge.s32.totalorder %s828_s15, 1  ;;  %p141_p8 = scmp.lt.s32.totalorder %s828_s15, 3 }
   0xc   : > { %p142_p9 = pnand %p621_p7, %p141_p8 }
   0xd   : > { %v784_v0 = vld [vmem:[%s1049_s1] sm:$0xff] (!%p142_p9)   ;;  %s623_s26 = sshll.u32 (!%p142_p9), %s878_s16, 4  ;;  %v785_v1 = vld [vmem:[%s1049_s1 + $0x8] sm:$0xff] (!%p142_p9)   ;;  %vm244_vm0 = vcmask (!%p142_p9), 130048   ;;  %s162_s6 = sand.u32 (!%p142_p9), 1, %s820_s13  }
   0xe   : > { %145 = sbr.rel (%p142_p9) target bundleno = 277 (0x115), region = 32  ;;  %p166_p10 = scmp.lt.s32.totalorder (!%p142_p9), %s623_s26, 31  ;;  %696 = vmatprep.subr.bf16.mxu0 (!%p142_p9), %v784_v0  ;;  %714 = vmatprep.subr.bf16.mxu1 (!%p142_p9), %v785_v1  ;;  %v937_v10 = vld [vmem:[%s1050_s2] ss:$0 sm:$0xff] (!%p142_p9)  ;;  %v942_v11 = vld [vmem:[%s1050_s2 + $0x1] ss:$0 sm:$0xff] (!%p142_p9) }
   0xf   : > { %697 = vmatpush3.bf16.msra.mxu0 (!%p142_p9), %v784_v0  ;;  %715 = vmatpush3.bf16.msra.mxu1 (!%p142_p9), %v785_v1  ;;  %s622_s7 = sshll.u32 (!%p142_p9), %s162_s6, 8  ;;  %s514_s19 = scalar_lea.sflag (!%p142_p9), [#allocation3], %s162_s6 }
  0x10   : > { %s948_s17 = scalar_lea.vmem (!%p142_p9), [#allocation2], %s622_s7 }
  0x15   : > { %s1059_s26 = smov (!%p166_p10, %s623_s26), 31 }
  0x16   : > { %s624_s29 = sshll.u32 %s1059_s26, 2 }
  0x17   : > { %s169_s5 = scalar_lea.vmem %s1048_s0, %s624_s29 }
  0x18   : > { %v786_v2 = vld [vmem:[%s169_s5] sm:$0xff]   ;;  %v787_v3 = vld [vmem:[%s169_s5 + $0x8] sm:$0xff]   ;;  %v788_v4 = vld [vmem:[%s169_s5 + $0x10] sm:$0xff]  }
  0x19   : > { %698 = vmatprep.mubr.msk.bf16.mxu0 %vm244_vm0, %v786_v2  ;;  %716 = vmatprep.mubr.msk.bf16.mxu1 %vm244_vm0, %v786_v2  ;;  %v789_v5 = vld [vmem:[%s169_s5 + $0x18] sm:$0xff]   ;;  %v790_v6 = vld [vmem:[%s169_s5 + $0x20] sm:$0xff]   ;;  %v791_v7 = vld [vmem:[%s169_s5 + $0x28] sm:$0xff]  }
  0x1a   : > { %699 = vmatmul.mubr.msk.bf16.vlgmr.msra.gmra.mrb[0].mxu0 %vm244_vm0, %v787_v3  ;;  %717 = vmatmul.mubr.msk.bf16.vlgmr.msra.gmra.mrb[0].mxu1 %vm244_vm0, %v787_v3  ;;  %v792_v8 = vld [vmem:[%s169_s5 + $0x30] sm:$0xff]   ;;  %v793_v9 = vld [vmem:[%s169_s5 + $0x38] sm:$0xff]  }
  0x1b   : > { %702 = vmatprep.mubr.msk.bf16.mxu0 %vm244_vm0, %v788_v4  ;;  %720 = vmatprep.mubr.msk.bf16.mxu1 %vm244_vm0, %v788_v4 }
  0x22   : > { %703 = vmatmul.mubr.msk.bf16.gmra.mrb[4].mxu0 %vm244_vm0, %v789_v5  ;;  %721 = vmatmul.mubr.msk.bf16.gmra.mrb[4].mxu1 %vm244_vm0, %v789_v5 }
  0x23   : > { %706 = vmatprep.mubr.msk.bf16.mxu0 %vm244_vm0, %v790_v6  ;;  %724 = vmatprep.mubr.msk.bf16.mxu1 %vm244_vm0, %v790_v6 }
  0x2a   : > { %707 = vmatmul.mubr.msk.bf16.gmra.mrb[8].mxu0 %vm244_vm0, %v791_v7  ;;  %725 = vmatmul.mubr.msk.bf16.gmra.mrb[8].mxu1 %vm244_vm0, %v791_v7 }
  0x2b   : > { %710 = vmatprep.mubr.msk.bf16.mxu0 %vm244_vm0, %v792_v8  ;;  %728 = vmatprep.mubr.msk.bf16.mxu1 %vm244_vm0, %v792_v8 }
  0x32   : > { %711 = vmatmul.mubr.msk.bf16.gmra.mrb[12].mxu0 %vm244_vm0, %v793_v9  ;;  %729 = vmatmul.mubr.msk.bf16.gmra.mrb[12].mxu1 %vm244_vm0, %v793_v9 }
  0xed   : > { %v700_v12 = vpop.f32.mrb[0].mxu0  ;;  %v718_v13 = vpop.f32.mrb[0].mxu1 }
  0xee   : > { %v312_v14 = vadd.f32 %v700_v12, %v937_v10  ;;  %v442_v15 = vadd.f32 %v718_v13, %v942_v11  ;;  %v303_v16 = vpop.f32.mrb[1].mxu0  ;;  %v433_v17 = vpop.f32.mrb[1].mxu1 }
  0xef   : > { %v304_v18 = vadd.f32 %v937_v10, %v303_v16  ;;  %v434_v19 = vadd.f32 %v942_v11, %v433_v17  ;;  %v701_v20 = vpop.f32.mrb[2].mxu0  ;;  %v719_v21 = vpop.f32.mrb[2].mxu1 }
  0xf0   : > { %368 = vst [vmem:[%s948_s17 + $0x10] sm:$0xff] %v312_v14  ;;  %658 = vst [vmem:[%s948_s17 + $0x90] sm:$0xff] %v442_v15  ;;  %v315_v22 = vadd.f32 %v701_v20, %v937_v10  ;;  %v445_v23 = vadd.f32 %v719_v21, %v942_v11  ;;  %v306_v24 = vpop.f32.mrb[3].mxu0  ;;  %v436_v25 = vpop.f32.mrb[3].mxu1 }
  0xf1   : > { %366 = vst [vmem:[%s948_s17] sm:$0xff] %v304_v18  ;;  %656 = vst [vmem:[%s948_s17 + $0x80] sm:$0xff] %v434_v19  ;;  %v307_v26 = vadd.f32 %v937_v10, %v306_v24  ;;  %v437_v27 = vadd.f32 %v942_v11, %v436_v25 }
  0xf2   : > { %369 = vst [vmem:[%s948_s17 + $0x18] sm:$0xff] %v315_v22  ;;  %659 = vst [vmem:[%s948_s17 + $0x98] sm:$0xff] %v445_v23 }
  0xf3   : > { %367 = vst [vmem:[%s948_s17 + $0x8] sm:$0xff] %v307_v26  ;;  %657 = vst [vmem:[%s948_s17 + $0x88] sm:$0xff] %v437_v27 }
  0xf5   : > { %v704_v28 = vpop.f32.mrb[4].mxu0  ;;  %v722_v29 = vpop.f32.mrb[4].mxu1 }
  0xf6   : > { %v328_v30 = vadd.f32 %v704_v28, %v937_v10  ;;  %v458_v31 = vadd.f32 %v722_v29, %v942_v11  ;;  %v319_v32 = vpop.f32.mrb[5].mxu0  ;;  %v449_v33 = vpop.f32.mrb[5].mxu1 }
  0xf7   : > { %v320_v34 = vadd.f32 %v937_v10, %v319_v32  ;;  %v450_v35 = vadd.f32 %v942_v11, %v449_v33  ;;  %v705_v36 = vpop.f32.mrb[6].mxu0  ;;  %v723_v37 = vpop.f32.mrb[6].mxu1 }
  0xf8   : > { %372 = vst [vmem:[%s948_s17 + $0x30] sm:$0xff] %v328_v30  ;;  %662 = vst [vmem:[%s948_s17 + $0xb0] sm:$0xff] %v458_v31  ;;  %v331_v38 = vadd.f32 %v705_v36, %v937_v10  ;;  %v461_v39 = vadd.f32 %v723_v37, %v942_v11  ;;  %v322_v40 = vpop.f32.mrb[7].mxu0  ;;  %v452_v41 = vpop.f32.mrb[7].mxu1 }
  0xf9   : > { %370 = vst [vmem:[%s948_s17 + $0x20] sm:$0xff] %v320_v34  ;;  %660 = vst [vmem:[%s948_s17 + $0xa0] sm:$0xff] %v450_v35  ;;  %v323_v42 = vadd.f32 %v937_v10, %v322_v40  ;;  %v453_v43 = vadd.f32 %v942_v11, %v452_v41 }
  0xfa   : > { %373 = vst [vmem:[%s948_s17 + $0x38] sm:$0xff] %v331_v38  ;;  %663 = vst [vmem:[%s948_s17 + $0xb8] sm:$0xff] %v461_v39 }
  0xfb   : > { %371 = vst [vmem:[%s948_s17 + $0x28] sm:$0xff] %v323_v42  ;;  %661 = vst [vmem:[%s948_s17 + $0xa8] sm:$0xff] %v453_v43 }
  0xfd   : > { %v708_v44 = vpop.f32.mrb[8].mxu0  ;;  %v726_v45 = vpop.f32.mrb[8].mxu1 }
  0xfe   : > { %v344_v46 = vadd.f32 %v708_v44, %v937_v10  ;;  %v474_v47 = vadd.f32 %v726_v45, %v942_v11  ;;  %v335_v48 = vpop.f32.mrb[9].mxu0  ;;  %v465_v49 = vpop.f32.mrb[9].mxu1 }
  0xff   : > { %v336_v50 = vadd.f32 %v937_v10, %v335_v48  ;;  %v466_v51 = vadd.f32 %v942_v11, %v465_v49  ;;  %v709_v52 = vpop.f32.mrb[10].mxu0  ;;  %v727_v53 = vpop.f32.mrb[10].mxu1 }
 0x100   : > { %376 = vst [vmem:[%s948_s17 + $0x50] sm:$0xff] %v344_v46  ;;  %666 = vst [vmem:[%s948_s17 + $0xd0] sm:$0xff] %v474_v47  ;;  %v347_v54 = vadd.f32 %v709_v52, %v937_v10  ;;  %v477_v55 = vadd.f32 %v727_v53, %v942_v11  ;;  %v338_v56 = vpop.f32.mrb[11].mxu0  ;;  %v468_v57 = vpop.f32.mrb[11].mxu1 }
 0x101   : > { %374 = vst [vmem:[%s948_s17 + $0x40] sm:$0xff] %v336_v50  ;;  %664 = vst [vmem:[%s948_s17 + $0xc0] sm:$0xff] %v466_v51  ;;  %v339_v58 = vadd.f32 %v937_v10, %v338_v56  ;;  %v469_v59 = vadd.f32 %v942_v11, %v468_v57 }
 0x102   : > { %377 = vst [vmem:[%s948_s17 + $0x58] sm:$0xff] %v347_v54  ;;  %667 = vst [vmem:[%s948_s17 + $0xd8] sm:$0xff] %v477_v55 }
 0x103   : > { %375 = vst [vmem:[%s948_s17 + $0x48] sm:$0xff] %v339_v58  ;;  %665 = vst [vmem:[%s948_s17 + $0xc8] sm:$0xff] %v469_v59 }
 0x105   : > { %v712_v60 = vpop.f32.mrb[12].mxu0  ;;  %v730_v61 = vpop.f32.mrb[12].mxu1 }
 0x106   : > { %v360_v62 = vadd.f32 %v712_v60, %v937_v10  ;;  %v490_v63 = vadd.f32 %v730_v61, %v942_v11  ;;  %v351_v0 = vpop.f32.mrb[13].mxu0  ;;  %v481_v1 = vpop.f32.mrb[13].mxu1 }
 0x107   : > { %v352_v2 = vadd.f32 %v937_v10, %v351_v0  ;;  %v482_v3 = vadd.f32 %v942_v11, %v481_v1  ;;  %v713_v4 = vpop.f32.mrb[14].mxu0  ;;  %v731_v5 = vpop.f32.mrb[14].mxu1 }
 0x108   : > { %380 = vst [vmem:[%s948_s17 + $0x70] sm:$0xff] %v360_v62  ;;  %670 = vst [vmem:[%s948_s17 + $0xf0] sm:$0xff] %v490_v63  ;;  %v363_v6 = vadd.f32 %v713_v4, %v937_v10  ;;  %v493_v7 = vadd.f32 %v731_v5, %v942_v11  ;;  %v354_v8 = vpop.f32.mrb[15].mxu0  ;;  %v484_v9 = vpop.f32.mrb[15].mxu1 }
 0x109   : > { %378 = vst [vmem:[%s948_s17 + $0x60] sm:$0xff] %v352_v2  ;;  %668 = vst [vmem:[%s948_s17 + $0xe0] sm:$0xff] %v482_v3  ;;  %v355_v12 = vadd.f32 %v937_v10, %v354_v8  ;;  %v485_v13 = vadd.f32 %v942_v11, %v484_v9 }
 0x10a   : > { %381 = vst [vmem:[%s948_s17 + $0x78] sm:$0xff] %v363_v6  ;;  %671 = vst [vmem:[%s948_s17 + $0xf8] sm:$0xff] %v493_v7 }
 0x10b   : > { %379 = vst [vmem:[%s948_s17 + $0x68] sm:$0xff] %v355_v12  ;;  %669 = vst [vmem:[%s948_s17 + $0xe8] sm:$0xff] %v485_v13 }
 0x10c   : > { %s677_s20 = sshll.u32 %s878_s16, 11  ;;  %s543_s24 = sshll.u32 %s948_s17, 4  ;;  %s544_s24 = int_to_ptr.vmem [resolvable:$true] %s543_s24 }
 0x10d   : > { %s526_s27 = scalar_lea.hbm %s1051_s3, %s677_s20  ;;  %s830_s28 = smov 2048  }
 0x10e   : > { %732 = sst [smem:[#allocation5]] (%p895_p5), %s830_s28  ;;  %s831_s29 = smov 4096  }
 0x10f   : > { %733 = sst [smem:[#allocation5 + $0x1]] (%p895_p5), %s831_s29  ;;  %s832_s30 = smov 16  }
 0x110   : > { %734 = sst [smem:[#allocation5 + $0x2]] (%p895_p5), %s832_s30  ;;  %s833_s4 = smov 128  }
 0x111   : > { %735 = sst [smem:[#allocation5 + $0x3]] (%p895_p5), %s833_s4  ;;  %s834_s16 = smov 8  }
 0x112   : > { %736 = sst [smem:[#allocation5 + $0x4]] (%p895_p5), %s833_s4  ;;  %s835_s5 = smov [#allocation4]  }
 0x113   : > { %737 = sst [smem:[#allocation5 + $0x5]] (%p895_p5), %s834_s16  ;;  %s836_s6 = smov 0  }
 0x114   : > { %738 = dma.general (%p895_p5), %s544_s24, 4096, %s526_s27, %s514_s19, %s835_s5, [#allocation5], %s836_s6, 0  }
 0x115 PF: > { %p744_p11 = scmp.ge.s32.totalorder %s828_s15, 2  ;;  %s571_s7 = sand.u32 1, %s816_s12  }
 0x116   : > { %s572_s8 = scalar_lea.sflag [#allocation3], %s571_s7 }
 0x117   : > { %p741_p12 = pnand %p744_p11, %p899_p6 }
 0x119   : > { %811 = dma.done.wait (!%p741_p12), %s572_s8, 4096  }
 0x11a   : > { %813 = vsyncadd (!%p741_p12), %s572_s8, 4294963200  ;;  %p13_p13 = scmp.ge.s32.totalorder %s882_s18, 4   ;;  %s1054_s12 = smov %s820_s13 }
 0x11b   : > { %s1055_s13 = smov %s824_s14  ;;  %s1056_s14 = smov %s893_s21 }
 0x11c   : > { %s1057_s15 = smov %s882_s18  ;;  %15 = sbr.rel (!%p13_p13) target bundleno = 3 (0x3), region = 75 }
 0x123   :  { %577 = vsyncpa [#allocation3], 1 }
 0x124   :  { %579 = vsyncpa [#allocation3 + $0x1], 1 }

</bundles_post_ra>
